<compile_context>
chip_gen: v6e
topology: v6e:2x2x1
jax: 0.10.0
libtpu: 0.0.40
codegen_flags: <defaults>
</compile_context>

<pallas_src>
import functools
import math

import jax
import jax.numpy as jnp
from jax.experimental import pallas as pl
from jax.experimental.pallas import tpu as pltpu

# ----------------------------- config (small) -----------------------------
BATCH = 2
SEQ = 8
HIDDEN = 64          # stands in for 768
N_HEADS = 2          # stands in for 12
HEAD_DIM = HIDDEN // N_HEADS
FFN = 128            # stands in for 3072
N_LAYERS = 2         # stands in for 6
VOCAB = 128
MAX_POS = 16
N_CLASSES = 9
CLS_PAD = 128        # classifier output padded to a full lane width
LN_EPS = 1e-12

_VMEM_SPEC = pl.BlockSpec(memory_space=pltpu.MemorySpace.VMEM)


# ------------------------------- helpers -----------------------------------
def _gelu(x):
    # tanh-approx GELU (EUP-friendly), computed in f32.
    # TODO(synk): exact erf-GELU if bit-matching HF DistilBERT is required.
    c = math.sqrt(2.0 / math.pi)
    return 0.5 * x * (1.0 + jnp.tanh(c * (x + 0.044715 * x * x * x)))


def _layernorm(h, gamma, beta, eps):
    # f32 statistics (eps=1e-12 is below bf16 resolution).
    mu = jnp.mean(h, axis=-1, keepdims=True)
    var = jnp.mean((h - mu) * (h - mu), axis=-1, keepdims=True)
    return (h - mu) * jax.lax.rsqrt(var + eps) * gamma + beta


# ------------------------------- kernels -----------------------------------
def ln_kernel(x_ref, g_ref, b_ref, o_ref, *, eps):
    """o = LayerNorm(x) (no residual — used for the embedding LN)."""
    o_ref[...] = _layernorm(x_ref[...], g_ref[...], b_ref[...], eps)


def qkv_kernel(x_ref, w_ref, b_ref, o_ref):
    """Fused Q/K/V projection: o = x @ w_qkv + b_qkv  (bf16 MXU, f32 acc)."""
    x = x_ref[...].astype(jnp.bfloat16)
    y = jnp.dot(x, w_ref[...], preferred_element_type=jnp.float32) + b_ref[...]
    o_ref[...] = y.astype(jnp.bfloat16)


def attn_kernel(q_ref, k_ref, v_ref, m_ref, o_ref, *, scale):
    """All (batch*heads) scaled dot-product attention in one invocation.

    q,k,v: [BH, S, Dh] bf16; m: [BH, 1, S] additive mask (f32)."""
    q = q_ref[...]
    k = k_ref[...]
    v = v_ref[...]
    s = jnp.einsum("bqd,bkd->bqk", q, k,
                   preferred_element_type=jnp.float32) * scale + m_ref[...]
    s = s - jnp.max(s, axis=-1, keepdims=True)
    p = jnp.exp(s)                                                # f32 softmax
    p = p * pl.reciprocal(jnp.sum(p, axis=-1, keepdims=True), approx=True)
    o = jnp.einsum("bqk,bkd->bqd", p.astype(jnp.bfloat16), v,
                   preferred_element_type=jnp.float32)
    o_ref[...] = o.astype(jnp.bfloat16)


def linear_residual_ln_kernel(x_ref, w_ref, b_ref, r_ref, g_ref, be_ref, o_ref,
                              *, eps):
    """o = LayerNorm((x @ w + b) + residual)  — fused attention output proj."""
    y = jnp.dot(x_ref[...].astype(jnp.bfloat16), w_ref[...],
                preferred_element_type=jnp.float32) + b_ref[...]
    h = y + r_ref[...]
    o_ref[...] = _layernorm(h, g_ref[...], be_ref[...], eps)


def ffn_residual_ln_kernel(x_ref, w1_ref, b1_ref, w2_ref, b2_ref,
                           g_ref, be_ref, o_ref, *, eps):
    """Whole FFN block: o = LayerNorm(gelu(x@w1+b1)@w2 + b2 + x)."""
    x = x_ref[...]                                                # f32 residual
    h1 = jnp.dot(x.astype(jnp.bfloat16), w1_ref[...],
                 preferred_element_type=jnp.float32) + b1_ref[...]
    h1 = _gelu(h1)                                                # f32 GELU
    h2 = jnp.dot(h1.astype(jnp.bfloat16), w2_ref[...],
                 preferred_element_type=jnp.float32) + b2_ref[...]
    o_ref[...] = _layernorm(h2 + x, g_ref[...], be_ref[...], eps)


def head_kernel(x_ref, w1_ref, b1_ref, w2_ref, b2_ref, o_ref):
    """Fused classification head: tanh(x@w1+b1) @ w2_padded + b2_padded."""
    p = jnp.dot(x_ref[...].astype(jnp.bfloat16), w1_ref[...],
                preferred_element_type=jnp.float32) + b1_ref[...]
    p = jnp.tanh(p)                                               # f32 tanh
    # dropout p=0.1 -> identity at inference
    o_ref[...] = jnp.dot(p.astype(jnp.bfloat16), w2_ref[...],
                         preferred_element_type=jnp.float32) + b2_ref[...]


# ----------------------------- pallas wrappers ------------------------------
def layernorm(x, gamma, beta, eps=LN_EPS):
    return pl.pallas_call(
        functools.partial(ln_kernel, eps=eps),
        out_shape=jax.ShapeDtypeStruct(x.shape, jnp.float32),
        in_specs=[_VMEM_SPEC] * 3,
        out_specs=_VMEM_SPEC,
    )(x, gamma, beta)


def qkv_projection(x, w_qkv, b_qkv):
    M = x.shape[0]
    return pl.pallas_call(
        qkv_kernel,
        out_shape=jax.ShapeDtypeStruct((M, 3 * HIDDEN), jnp.bfloat16),
        in_specs=[_VMEM_SPEC] * 3,
        out_specs=_VMEM_SPEC,
    )(x, w_qkv, b_qkv)


def attention(q, k, v, mask_add_bh):
    """q,k,v: [B*H, S, Dh] bf16; mask_add_bh: [B*H, 1, S] additive f32."""
    BH, S, Dh = q.shape
    scale = 1.0 / math.sqrt(Dh)
    return pl.pallas_call(
        functools.partial(attn_kernel, scale=scale),
        out_shape=jax.ShapeDtypeStruct((BH, S, Dh), jnp.bfloat16),
        in_specs=[_VMEM_SPEC] * 4,
        out_specs=_VMEM_SPEC,
    )(q, k, v, mask_add_bh)


def linear_residual_ln(x, w, b, residual, gamma, beta, eps=LN_EPS):
    M = x.shape[0]
    N = w.shape[1]
    return pl.pallas_call(
        functools.partial(linear_residual_ln_kernel, eps=eps),
        out_shape=jax.ShapeDtypeStruct((M, N), jnp.float32),
        in_specs=[_VMEM_SPEC] * 6,
        out_specs=_VMEM_SPEC,
    )(x, w, b, residual, gamma, beta)


def ffn_residual_ln(x, w1, b1, w2, b2, gamma, beta, eps=LN_EPS):
    return pl.pallas_call(
        functools.partial(ffn_residual_ln_kernel, eps=eps),
        out_shape=jax.ShapeDtypeStruct(x.shape, jnp.float32),
        in_specs=[_VMEM_SPEC] * 7,
        out_specs=_VMEM_SPEC,
    )(x, w1, b1, w2, b2, gamma, beta)


def classification_head(pooler, w_pre, b_pre, w_cls_pad, b_cls_pad):
    B = pooler.shape[0]
    out = pl.pallas_call(
        head_kernel,
        out_shape=jax.ShapeDtypeStruct((B, CLS_PAD), jnp.float32),
        in_specs=[_VMEM_SPEC] * 5,
        out_specs=_VMEM_SPEC,
    )(pooler, w_pre, b_pre, w_cls_pad, b_cls_pad)
    return out[:, :N_CLASSES]          # padded lanes carry zero weight/bias


# ----------------------------- parameter init ------------------------------
def init_params(key):
    def nrm(key, shape):
        return (0.02 * jax.random.normal(key, shape)).astype(jnp.bfloat16)

    keys = iter(jax.random.split(key, 8 + N_LAYERS * 8))

    cls_w = jnp.zeros((HIDDEN, CLS_PAD), jnp.bfloat16)
    cls_w = cls_w.at[:, :N_CLASSES].set(nrm(next(keys), (HIDDEN, N_CLASSES)))

    p = {
        "word_emb": (0.02 * jax.random.normal(next(keys), (VOCAB, HIDDEN))
                     ).astype(jnp.float32),
        "pos_emb": (0.02 * jax.random.normal(next(keys), (MAX_POS, HIDDEN))
                    ).astype(jnp.float32),
        "emb_ln_g": jnp.ones((1, HIDDEN), jnp.float32),
        "emb_ln_b": jnp.zeros((1, HIDDEN), jnp.float32),
        "layers": [],
        "pre_classifier_w": nrm(next(keys), (HIDDEN, HIDDEN)),
        "pre_classifier_b": jnp.zeros((1, HIDDEN), jnp.float32),
        "classifier_w_pad": cls_w,
        "classifier_b_pad": jnp.zeros((1, CLS_PAD), jnp.float32),
    }
    for _ in range(N_LAYERS):
        layer = {
            # fused QKV projection weight: [H, 3H]
            "w_qkv": nrm(next(keys), (HIDDEN, 3 * HIDDEN)),
            "b_qkv": jnp.zeros((1, 3 * HIDDEN), jnp.float32),
            "wo": nrm(next(keys), (HIDDEN, HIDDEN)),
            "bo": jnp.zeros((1, HIDDEN), jnp.float32),
            "sa_ln_g": jnp.ones((1, HIDDEN), jnp.float32),
            "sa_ln_b": jnp.zeros((1, HIDDEN), jnp.float32),
            "w1": nrm(next(keys), (HIDDEN, FFN)),
            "b1": jnp.zeros((1, FFN), jnp.float32),
            "w2": nrm(next(keys), (FFN, HIDDEN)),
            "b2": jnp.zeros((1, HIDDEN), jnp.float32),
            "out_ln_g": jnp.ones((1, HIDDEN), jnp.float32),
            "out_ln_b": jnp.zeros((1, HIDDEN), jnp.float32),
        }
        p["layers"].append(layer)
    return p


# ------------------------------ forward pass --------------------------------
def split_qkv_heads(qkv):
    # [B*S, 3H] -> three [B*heads, S, head_dim]
    x = qkv.reshape(BATCH, SEQ, 3, N_HEADS, HEAD_DIM)
    x = jnp.transpose(x, (2, 0, 3, 1, 4))          # (3, B, heads, S, Dh)
    x = x.reshape(3, BATCH * N_HEADS, SEQ, HEAD_DIM)
    return x[0], x[1], x[2]


def merge_heads(x):
    # [B*heads, S, head_dim] -> [B*S, H]
    x = x.reshape(BATCH, N_HEADS, SEQ, HEAD_DIM)
    x = jnp.transpose(x, (0, 2, 1, 3))
    return x.reshape(BATCH * SEQ, HIDDEN)


def distilbert_class_forward(params, input_ids, attention_mask, token_type_ids):
    del token_type_ids  # unused by DistilBERT (matches PyTorch module semantics)

    # --- embeddings (gather is glue; LayerNorm is a Pallas kernel) ---
    word = jnp.take(params["word_emb"], input_ids, axis=0)          # (B, S, H)
    pos = params["pos_emb"][:SEQ][None, :, :]                       # (1, S, H)
    emb = (word + pos).reshape(BATCH * SEQ, HIDDEN)
    h = layernorm(emb, params["emb_ln_g"], params["emb_ln_b"])
    # dropout p=0.1 -> identity at inference

    # additive attention mask over keys: 0 where valid, -1e9 where padded,
    # broadcast per head: (B*H, 1, S)
    mask_add = ((1.0 - attention_mask.astype(jnp.float32)) * -1e9
                ).reshape(BATCH, 1, 1, SEQ)
    mask_add_bh = jnp.broadcast_to(
        mask_add, (BATCH, N_HEADS, 1, SEQ)).reshape(BATCH * N_HEADS, 1, SEQ)

    # --- transformer blocks (4 pallas_calls per layer) ---
    for layer in params["layers"]:
        qkv = qkv_projection(h, layer["w_qkv"], layer["b_qkv"])     # fused QKV
        q, k, v = split_qkv_heads(qkv)
        ctx = merge_heads(attention(q, k, v, mask_add_bh))          # all heads
        h = linear_residual_ln(ctx, layer["wo"], layer["bo"], h,    # proj + LN
                               layer["sa_ln_g"], layer["sa_ln_b"])
        h = ffn_residual_ln(h, layer["w1"], layer["b1"],            # whole FFN
                            layer["w2"], layer["b2"],
                            layer["out_ln_g"], layer["out_ln_b"])

    # --- classification head (single fused pallas_call) ---
    hidden_state = h.reshape(BATCH, SEQ, HIDDEN)
    pooler = hidden_state[:, 0]                                     # (B, H) CLS
    logits = classification_head(pooler,
                                 params["pre_classifier_w"],
                                 params["pre_classifier_b"],
                                 params["classifier_w_pad"],
                                 params["classifier_b_pad"])
    return logits                                                   # (B, 9)


# ---------------------------------- main ------------------------------------
if __name__ == "__main__":
    key = jax.random.PRNGKey(0)
    k_param, k_ids = jax.random.split(key)

    params = init_params(k_param)
    input_ids = jax.random.randint(k_ids, (BATCH, SEQ), 0, VOCAB, dtype=jnp.int32)
    attention_mask = jnp.ones((BATCH, SEQ), jnp.int32).at[1, SEQ - 2:].set(0)
    token_type_ids = jnp.zeros((BATCH, SEQ), jnp.int32)

    logits = distilbert_class_forward(params, input_ids, attention_mask,
                                      token_type_ids)
    logits = jax.block_until_ready(logits)
    assert logits.shape == (BATCH, N_CLASSES) and logits.dtype == jnp.float32
    print("KERNEL_OK")
</pallas_src>

<mosaic_0001>
module attributes {stable_mosaic.version = 11 : i64} {
  func.func @ln_kernel(%arg0: memref<16x64xf32, #tpu.memory_space<vmem>>, %arg1: memref<1x64xf32, #tpu.memory_space<vmem>>, %arg2: memref<1x64xf32, #tpu.memory_space<vmem>>, %arg3: memref<16x64xf32, #tpu.memory_space<vmem>>) attributes {dimension_semantics = [], scalar_prefetch = 0 : i64, scratch_operands = 0 : i64, tpu.core_type = #tpu.core_type<tc>} {
    %c0 = arith.constant 0 : index
    %c0_0 = arith.constant 0 : index
    %0 = vector.load %arg0[%c0, %c0_0] : memref<16x64xf32, #tpu.memory_space<vmem>>, vector<16x64xf32>
    %c0_1 = arith.constant 0 : index
    %c0_2 = arith.constant 0 : index
    %1 = vector.load %arg1[%c0_1, %c0_2] : memref<1x64xf32, #tpu.memory_space<vmem>>, vector<1x64xf32>
    %c0_3 = arith.constant 0 : index
    %c0_4 = arith.constant 0 : index
    %2 = vector.load %arg2[%c0_3, %c0_4] : memref<1x64xf32, #tpu.memory_space<vmem>>, vector<1x64xf32>
    %cst = arith.constant dense<0.000000e+00> : vector<16xf32>
    %3 = vector.multi_reduction <add>, %0, %cst [1] : vector<16x64xf32> to vector<16xf32>
    %4 = vector.shape_cast %3 : vector<16xf32> to vector<16x1xf32>
    %cst_5 = arith.constant 6.400000e+01 : f32
    %5 = vector.broadcast %cst_5 : f32 to vector<16x1xf32>
    %6 = arith.divf %4, %5 : vector<16x1xf32>
    %7 = vector.broadcast %6 : vector<16x1xf32> to vector<16x64xf32>
    %8 = arith.subf %0, %7 : vector<16x64xf32>
    %9 = vector.broadcast %6 : vector<16x1xf32> to vector<16x64xf32>
    %10 = arith.subf %0, %9 : vector<16x64xf32>
    %11 = arith.mulf %8, %10 : vector<16x64xf32>
    %cst_6 = arith.constant dense<0.000000e+00> : vector<16xf32>
    %12 = vector.multi_reduction <add>, %11, %cst_6 [1] : vector<16x64xf32> to vector<16xf32>
    %13 = vector.shape_cast %12 : vector<16xf32> to vector<16x1xf32>
    %cst_7 = arith.constant 6.400000e+01 : f32
    %14 = vector.broadcast %cst_7 : f32 to vector<16x1xf32>
    %15 = arith.divf %13, %14 : vector<16x1xf32>
    %16 = vector.broadcast %6 : vector<16x1xf32> to vector<16x64xf32>
    %17 = arith.subf %0, %16 : vector<16x64xf32>
    %cst_8 = arith.constant 9.99999996E-13 : f32
    %18 = vector.broadcast %cst_8 : f32 to vector<16x1xf32>
    %19 = arith.addf %15, %18 : vector<16x1xf32>
    %20 = math.rsqrt %19 : vector<16x1xf32>
    %21 = vector.broadcast %20 : vector<16x1xf32> to vector<16x64xf32>
    %22 = arith.mulf %17, %21 : vector<16x64xf32>
    %23 = vector.broadcast %1 : vector<1x64xf32> to vector<16x64xf32>
    %24 = arith.mulf %22, %23 : vector<16x64xf32>
    %25 = vector.broadcast %2 : vector<1x64xf32> to vector<16x64xf32>
    %26 = arith.addf %24, %25 : vector<16x64xf32>
    %c0_9 = arith.constant 0 : index
    %c0_10 = arith.constant 0 : index
    %27 = vector.load %arg3[%c0_9, %c0_10] : memref<16x64xf32, #tpu.memory_space<vmem>>, vector<16x64xf32>
    tpu.vector_store %arg3[%c0_9, %c0_10], %26 {strides = array<i32>} : memref<16x64xf32, #tpu.memory_space<vmem>>, vector<16x64xf32>,
    return
  }
}

</mosaic_0001>

<bundles_post_ra>
// kernel: tpu_custom_call.1
= control target key start
LH: loop header
LB: loop body
LE: loop exit
PB: predicated region body
PF: predicated region fallthrough
CT: control target
= control target key end

     0   :  { %8 = vsyncpa [#allocation3], 0  ;;  %s198_s0 = inlined_call_operand.hbm [shape: f32[16,64], index: 0, kind: input, shape index: {}]   ;;  %s199_s1 = inlined_call_operand.vmem [shape: f32[1,64], index: 1, kind: input, shape index: {}]   ;;  %s200_s2 = inlined_call_operand.vmem [shape: f32[1,64], index: 2, kind: input, shape index: {}]   ;;  %s201_s3 = inlined_call_operand.hbm [shape: f32[16,64], index: 3, kind: output, shape index: {}]  }
   0x1   :  { %9 = vsyncpa [#allocation4], 0  ;;  %s150_s12 = smov [#allocation2]  }
   0x2   :  { %s15_s13 = sshll.u32 %s150_s12, 4  ;;  %s16_s13 = int_to_ptr.vmem [resolvable:$true] %s15_s13 }
   0x3   :  { %s114_s14 = scalar_lea.vmem %s16_s13, 256  ;;  %p119_p1 = scmp.lt.s32.totalorder %s16_s13, %s16_s13 }
   0x4   :  { %p115_p0 = scmp.ne.s32.totalorder %s16_s13, %s114_s14  ;;  %p120_p2 = scmp.lt.s32.totalorder %s114_s14, %s114_s14 }
   0x6   :  { %p121_p3 = por %p120_p2, %p119_p1 }
   0x8   :  { %p122_p4 = pnand %p121_p3, %p115_p0 }
   0xa   :  { %125 = shalt.err (!%p122_p4)
}
   0xb   :  { %s151_s15 = smov 128   ;;  %s152_s16 = smov 8  }
   0xc   :  { %21 = dma.hbm_to_vmem [thread:$0]  %s198_s0, 256, %s16_s13, [#allocation3], %s151_s15, %s151_s15, %s152_s16  }
   0xd   :  { %146 = dma.done.wait [#allocation3], 256  }
   0xe   :  { %147 = vsyncadd [#allocation3], 4294967040  ;;  %vm33_vm0 = vcmask 523264   ;;  %v29_v0 = vld [vmem:[#allocation2] sm:$0xff]  ;;  %v30_v1 = vld [vmem:[#allocation2 + $0x8] sm:$0xff]  ;;  %s153_s22 = smov [#allocation5]  }
   0xf   :  { %v34_v2 = vsel %vm33_vm0, %v29_v0, 0.0  ;;  %v37_v3 = vsel %vm33_vm0, %v30_v1, 0.0  ;;  %v96_v21 = vld [vmem:[%s199_s1] ss:$0 sm:$0xff]  ;;  %s84_s23 = sshll.u32 %s153_s22, 4  ;;  %s85_s23 = int_to_ptr.vmem [resolvable:$true] %s84_s23 }
  0x10   :  { %35 = vadd.xlane.f32.xlu0 %v34_v2  ;;  %v97_v23 = vld [vmem:[%s200_s2] ss:$0 sm:$0xff]  ;;  %s126_s24 = scalar_lea.vmem %s85_s23, 256  ;;  %p131_p6 = scmp.lt.s32.totalorder %s85_s23, %s85_s23 }
  0x11   :  { %p127_p5 = scmp.ne.s32.totalorder %s85_s23, %s126_s24  ;;  %p132_p7 = scmp.lt.s32.totalorder %s126_s24, %s126_s24 }
  0x13   :  { %p133_p8 = por %p132_p7, %p131_p6 }
  0x14   :  { %38 = vadd.xlane.f32.xlu0 %v37_v3 }
  0x15   :  { %p134_p9 = pnand %p133_p8, %p127_p5 }
  0x99   :  { %v36_v4 = vpop.xlane.xlu0 %35 }
  0x9a   :  { %v41_v5 = vmul.f32 0.015625, %v36_v4 }
  0x9c   :  { %v43_v6 = vsub.f32 %v29_v0, %v41_v5 }
  0x9d   :  { %v39_v7 = vpop.xlane.xlu0 %38 }
  0x9e   :  { %v42_v8 = vmul.f32 0.015625, %v39_v7  ;;  %v45_v9 = vmul.f32 %v43_v6, %v43_v6 }
  0xa0   :  { %v44_v10 = vsub.f32 %v30_v1, %v42_v8  ;;  %v47_v11 = vsel %vm33_vm0, %v45_v9, 0.0 }
  0xa1   :  { %48 = vadd.xlane.f32.xlu1 %v47_v11 }
  0xa2   :  { %v46_v12 = vmul.f32 %v44_v10, %v44_v10 }
  0xa4   :  { %v50_v13 = vsel %vm33_vm0, %v46_v12, 0.0 }
  0xa5   :  { %51 = vadd.xlane.f32.xlu1 %v50_v13 }
 0x12a   :  { %v49_v14 = vpop.xlane.xlu1 %48 }
 0x12b   :  { %v53_v15 = vmul.f32 0.015625, %v49_v14 }
 0x12d   :  { %v55_v16 = vadd.f32 1e-12, %v53_v15 }
 0x12e   :  { %v52_v17 = vpop.xlane.xlu1 %51 }
 0x12f   :  { %102 = vrsqrt.f32 %v55_v16  ;;  %v54_v18 = vmul.f32 0.015625, %v52_v17 }
 0x131   :  { %v56_v19 = vadd.f32 1e-12, %v54_v18 }
 0x133   :  { %104 = vrsqrt.f32 %v56_v19 }
 0x13c   :  { %v103_v20 = vpop.eup %102 }
 0x13d   :  { %v59_v22 = vmul.f32 %v103_v20, %v43_v6 }
 0x13f   :  { %v67_v24 = vmul.f32 %v96_v21, %v59_v22 }
 0x140   :  { %v105_v25 = vpop.eup %104 }
 0x141   :  { %v60_v26 = vmul.f32 %v105_v25, %v44_v10  ;;  %v75_v27 = vadd.f32 %v97_v23, %v67_v24 }
 0x143   :  { %v68_v28 = vmul.f32 %v96_v21, %v60_v26  ;;  %77 = vst.msk [vmem:[#allocation5] sm:$0xff] %vm33_vm0, %v75_v27 }
 0x145   :  { %v76_v29 = vadd.f32 %v97_v23, %v68_v28 }
 0x147   :  { %78 = vst.msk [vmem:[#allocation5 + $0x8] sm:$0xff] %vm33_vm0, %v76_v29 }
 0x148   :  { %137 = shalt.err (!%p134_p9)
}
 0x149   :  { %90 = dma.vmem_to_hbm [thread:$0]  %s85_s23, 256, %s201_s3, [#allocation4], %s151_s15, %s151_s15, %s152_s16  }
 0x14a   :  { %148 = dma.done.wait [#allocation4], 256  }
 0x14b   :  { %149 = vsyncadd [#allocation4], 4294967040 }
 0x14c   :  { %94 = vsyncpa [#allocation3], 1 }
 0x14d   :  { %95 = vsyncpa [#allocation4], 1 }

</bundles_post_ra>
